<compile_context>
chip_gen: v6e
topology: v6e:2x2x1
jax: 0.10.0
libtpu: 0.0.40
codegen_flags: <defaults>
</compile_context>

<pallas_src>
import jax
import jax.numpy as jnp
from jax.experimental import pallas as pl
from jax.experimental.pallas import tpu as pltpu

DOUBLE_GATE = True
ENABLE_INJECTION_SCALE = True
RMS_EPS = 1.1920929e-07  # torch.finfo(float32).eps (nn.RMSNorm default eps=None)


# ---------------------------------------------------------------------------
# Fused kernel: RMSNorm + fused two-head gate matmuls + sigmoid mixing.
# The Linear on concat([hn, embed]) is split into two matmuls, and the two
# gate heads (inj / org) are fused along the output (N) axis:
#   logits = hn @ W_h(D,2D) + embed @ W_e(D,2D) + b(1,2D)
#   logits[:, :D] -> injection head, logits[:, D:] -> origin head
# ---------------------------------------------------------------------------
def _gate_kernel(scale_ref, h_ref, e_ref, g_ref, wh_ref, we_ref, b_ref, out_ref):
    h = h_ref[...]                                    # (TM, D) f32
    e = e_ref[...]                                    # (TM, D) f32

    # RMSNorm (row-wise) + elementwise affine.
    ms = jnp.mean(h * h, axis=-1, keepdims=True)
    hn = h * jax.lax.rsqrt(ms + RMS_EPS) * g_ref[...]

    # Fused gate logits: bf16 operands/weights, f32 accumulation on the MXU.
    logits = (
        jnp.dot(hn.astype(wh_ref.dtype), wh_ref[...],
                preferred_element_type=jnp.float32)
        + jnp.dot(e.astype(we_ref.dtype), we_ref[...],
                  preferred_element_type=jnp.float32)
        + b_ref[...]
    )                                                 # (TM, 2D) f32

    d = out_ref.shape[-1]
    inj_gate = 1.0 - 2.0 * jax.nn.sigmoid(logits[:, :d])   # 1 - injection_gate
    org_gate = 2.0 * jax.nn.sigmoid(logits[:, d:])          # origin_gate

    scale = scale_ref[0, 0]                           # global injection scale
    out_ref[...] = e * org_gate + scale * inj_gate * hn


def prepare_gate_params(params, *, weight_dtype=jnp.bfloat16):
    """One-time weight prep (do NOT call per forward): split the torch-style
    (out, 2*in) Linear weights into hn-/embed- parts, transpose to (in, out),
    fuse the two gate heads along the output axis, and cast to bf16."""
    d = params["gamma"].shape[-1]
    w_inj = params["w_inj"]                    # (D, 2D) torch layout (out, in)
    w_org = params["w_org"]                    # (D, 2D)
    w_h = jnp.concatenate([w_inj[:, :d].T, w_org[:, :d].T], axis=1)   # (D, 2D)
    w_e = jnp.concatenate([w_inj[:, d:].T, w_org[:, d:].T], axis=1)   # (D, 2D)
    b = jnp.concatenate([params["b_inj"], params["b_org"]]).reshape(1, 2 * d)
    return {
        "w_h": w_h.astype(weight_dtype),
        "w_e": w_e.astype(weight_dtype),
        "b": b.astype(jnp.float32),
        "gamma": params["gamma"].reshape(1, d).astype(jnp.float32),
    }


def gate_forward(hidden, embed, prep, *, tile_rows=256):
    """hidden, embed: [B, S, D] float32. prep: output of prepare_gate_params."""
    b, s, d = hidden.shape
    n = b * s
    h2 = hidden.reshape(n, d).astype(jnp.float32)
    e2 = embed.reshape(n, d).astype(jnp.float32)

    # injection_scale = sqrt(mean(embed**2)) — tiny global scalar reduction;
    # done in XLA so we don't pay a second serialized Pallas sweep over embed.
    if ENABLE_INJECTION_SCALE:
        scale = jnp.sqrt(jnp.sum(e2 * e2) / jnp.float32(n * d)).reshape(1, 1)
    else:
        scale = jnp.ones((1, 1), jnp.float32)

    # Row tiling: multiple of 8 sublanes, capped by (aligned) row count; pad N
    # with zero rows so ragged B*S is handled (padded rows are sliced off).
    tm = max(8, (tile_rows // 8) * 8)
    tm = min(tm, ((n + 7) // 8) * 8)
    n_pad = pl.cdiv(n, tm) * tm
    if n_pad != n:
        h2 = jnp.pad(h2, ((0, n_pad - n), (0, 0)))
        e2 = jnp.pad(e2, ((0, n_pad - n), (0, 0)))

    # Explicit VMEM budget: activations double-buffered + (double-buffered)
    # bf16 weights; raise above the scoped default, stay under v7x's 64 MiB.
    w_bytes = jnp.dtype(prep["w_h"].dtype).itemsize
    vmem_est = (3 * 2 * tm * d * 4            # h, e, out row tiles (x2 buffers)
                + 2 * 2 * d * 2 * d * w_bytes  # W_h, W_e (x2 buffers)
                + 2 * 3 * d * 4)               # gamma + bias
    vmem_limit = int(min(max(vmem_est + (8 << 20), 32 << 20), 64 << 20))
    # NOTE: on v7x with very large D, additionally single-buffer the constant-
    # index weight specs (pipeline_mode=pl.Buffered(1)) or K-tile the matmul.

    full = lambda i: (0, 0)
    out2 = pl.pallas_call(
        _gate_kernel,
        out_shape=jax.ShapeDtypeStruct((n_pad, d), jnp.float32),
        grid=(n_pad // tm,),
        in_specs=[
            pl.BlockSpec(memory_space=pltpu.SMEM),            # scale (1,1)
            pl.BlockSpec((tm, d), lambda i: (i, 0)),          # hidden rows
            pl.BlockSpec((tm, d), lambda i: (i, 0)),          # embed rows
            pl.BlockSpec((1, d), full),                       # gamma
            pl.BlockSpec((d, 2 * d), full),                   # W_h (bf16)
            pl.BlockSpec((d, 2 * d), full),                   # W_e (bf16)
            pl.BlockSpec((1, 2 * d), full),                   # bias
        ],
        out_specs=pl.BlockSpec((tm, d), lambda i: (i, 0)),
        compiler_params=pltpu.CompilerParams(
            dimension_semantics=("parallel",),                 # megacore shard
            vmem_limit_bytes=vmem_limit),
    )(scale, h2, e2, prep["gamma"], prep["w_h"], prep["w_e"], prep["b"])

    return out2[:n].reshape(b, s, d)


# ---------------------------------------------------------------------------
# Pure-JAX references.
# ---------------------------------------------------------------------------
def gate_reference_fp32(hidden, embed, params):
    """Mirrors the PyTorch forward exactly (full f32 weights)."""
    ms = jnp.mean(hidden * hidden, axis=-1, keepdims=True)
    hn = hidden * jax.lax.rsqrt(ms + RMS_EPS) * params["gamma"]
    x = jnp.concatenate([hn, embed], axis=-1)
    injection_gate = 1.0 - 2.0 * jax.nn.sigmoid(x @ params["w_inj"].T + params["b_inj"])
    scale = jnp.sqrt(jnp.mean(embed * embed)) if ENABLE_INJECTION_SCALE else 1.0
    if DOUBLE_GATE:
        origin_gate = 2.0 * jax.nn.sigmoid(x @ params["w_org"].T + params["b_org"])
        return embed * origin_gate + scale * injection_gate * hn
    return embed * (1.0 - injection_gate) + scale * injection_gate * hn


def gate_reference_matched(hidden, embed, params, prep):
    """Same math using the kernel's bf16 weights/operands + f32 accumulation."""
    b, s, d = hidden.shape
    ms = jnp.mean(hidden * hidden, axis=-1, keepdims=True)
    hn = hidden * jax.lax.rsqrt(ms + RMS_EPS) * params["gamma"]
    wdt = prep["w_h"].dtype
    logits = (
        jnp.dot(hn.reshape(-1, d).astype(wdt), prep["w_h"],
                preferred_element_type=jnp.float32)
        + jnp.dot(embed.reshape(-1, d).astype(wdt), prep["w_e"],
                  preferred_element_type=jnp.float32)
        + prep["b"]
    ).reshape(b, s, 2 * d)
    injection_gate = 1.0 - 2.0 * jax.nn.sigmoid(logits[..., :d])
    origin_gate = 2.0 * jax.nn.sigmoid(logits[..., d:])
    scale = jnp.sqrt(jnp.mean(embed * embed)) if ENABLE_INJECTION_SCALE else 1.0
    return embed * origin_gate + scale * injection_gate * hn


if __name__ == "__main__":
    # N = B*S = 74 (not a multiple of 8) -> exercises the ragged-row padding.
    B, S, D = 2, 37, 128
    key = jax.random.PRNGKey(0)
    k_h, k_e, k_wi, k_wo, k_bi, k_bo, k_g = jax.random.split(key, 7)

    hidden = jax.random.normal(k_h, (B, S, D), jnp.float32)
    embed = jax.random.normal(k_e, (B, S, D), jnp.float32)

    # Deterministic parameter init (module zero-inits -> degenerate; use small
    # random values so the kernel path is exercised).
    params = {
        "w_inj": 0.05 * jax.random.normal(k_wi, (D, 2 * D), jnp.float32),
        "b_inj": 0.05 * jax.random.normal(k_bi, (D,), jnp.float32),
        "w_org": 0.05 * jax.random.normal(k_wo, (D, 2 * D), jnp.float32),
        "b_org": 0.05 * jax.random.normal(k_bo, (D,), jnp.float32),
        "gamma": jnp.ones((D,), jnp.float32)
                 + 0.1 * jax.random.normal(k_g, (D,), jnp.float32),
    }

    prep = prepare_gate_params(params)   # one-time weight prep (outside forward)

    out = gate_forward(hidden, embed, prep, tile_rows=256)
    out = jax.block_until_ready(out)
    assert out.shape == (B, S, D) and out.dtype == jnp.float32

    # Tight check vs. a precision-matched reference (validates the kernel).
    ref_m = gate_reference_matched(hidden, embed, params, prep)
    err_m = jnp.max(jnp.abs(out - ref_m))
    assert jnp.allclose(out, ref_m, atol=5e-4, rtol=5e-4), f"matched err {err_m}"

    # Loose sanity check vs. the exact f32 PyTorch-equivalent forward
    # (difference is only the bf16 weight/operand quantization in the matmul).
    ref_f = gate_reference_fp32(hidden, embed, params)
    err_f = jnp.max(jnp.abs(out - ref_f))
    assert jnp.allclose(out, ref_f, atol=5e-2, rtol=5e-2), f"f32 err {err_f}"

    print("KERNEL_OK")
</pallas_src>

<mosaic_0001>
module attributes {stable_mosaic.version = 11 : i64} {
  func.func @_gate_kernel(%arg0: i32, %arg1: memref<1x1xf32, #tpu.memory_space<smem>>, %arg2: memref<80x128xf32, #tpu.memory_space<vmem>>, %arg3: memref<80x128xf32, #tpu.memory_space<vmem>>, %arg4: memref<1x128xf32, #tpu.memory_space<vmem>>, %arg5: memref<128x256xbf16, #tpu.memory_space<vmem>>, %arg6: memref<128x256xbf16, #tpu.memory_space<vmem>>, %arg7: memref<1x256xf32, #tpu.memory_space<vmem>>, %arg8: memref<80x128xf32, #tpu.memory_space<vmem>>) attributes {dimension_semantics = [#tpu.dimension_semantics<parallel>], iteration_bounds = array<i64: 1>, scalar_prefetch = 0 : i64, scratch_operands = 0 : i64, tpu.core_type = #tpu.core_type<tc>, window_params = [{transform_indices = @transform_0, window_bounds = array<i64: 1, 1>}, {transform_indices = @transform_1, window_bounds = array<i64: 80, 128>}, {transform_indices = @transform_2, window_bounds = array<i64: 80, 128>}, {pipeline_mode = #tpu.pipeline_mode<synchronous>, transform_indices = @transform_3, window_bounds = array<i64: 1, 128>}, {pipeline_mode = #tpu.pipeline_mode<synchronous>, transform_indices = @transform_4, window_bounds = array<i64: 128, 256>}, {pipeline_mode = #tpu.pipeline_mode<synchronous>, transform_indices = @transform_5, window_bounds = array<i64: 128, 256>}, {pipeline_mode = #tpu.pipeline_mode<synchronous>, transform_indices = @transform_6, window_bounds = array<i64: 1, 256>}, {transform_indices = @transform_7, window_bounds = array<i64: 80, 128>}]} {
    %c0 = arith.constant 0 : index
    %c0_0 = arith.constant 0 : index
    %0 = vector.load %arg2[%c0, %c0_0] : memref<80x128xf32, #tpu.memory_space<vmem>>, vector<80x128xf32>
    %c0_1 = arith.constant 0 : index
    %c0_2 = arith.constant 0 : index
    %1 = vector.load %arg3[%c0_1, %c0_2] : memref<80x128xf32, #tpu.memory_space<vmem>>, vector<80x128xf32>
    %2 = arith.mulf %0, %0 : vector<80x128xf32>
    %cst = arith.constant dense<0.000000e+00> : vector<80xf32>
    %3 = vector.multi_reduction <add>, %2, %cst [1] : vector<80x128xf32> to vector<80xf32>
    %4 = vector.shape_cast %3 : vector<80xf32> to vector<80x1xf32>
    %cst_3 = arith.constant 1.280000e+02 : f32
    %5 = vector.broadcast %cst_3 : f32 to vector<80x1xf32>
    %6 = arith.divf %4, %5 : vector<80x1xf32>
    %cst_4 = arith.constant 1.1920929E-7 : f32
    %7 = vector.broadcast %cst_4 : f32 to vector<80x1xf32>
    %8 = arith.addf %6, %7 : vector<80x1xf32>
    %9 = math.rsqrt %8 : vector<80x1xf32>
    %10 = vector.broadcast %9 : vector<80x1xf32> to vector<80x128xf32>
    %11 = arith.mulf %0, %10 : vector<80x128xf32>
    %c0_5 = arith.constant 0 : index
    %c0_6 = arith.constant 0 : index
    %12 = vector.load %arg4[%c0_5, %c0_6] : memref<1x128xf32, #tpu.memory_space<vmem>>, vector<1x128xf32>
    %13 = vector.broadcast %12 : vector<1x128xf32> to vector<80x128xf32>
    %14 = arith.mulf %11, %13 : vector<80x128xf32>
    %15 = arith.truncf %14 : vector<80x128xf32> to vector<80x128xbf16>
    %c0_7 = arith.constant 0 : index
    %c0_8 = arith.constant 0 : index
    %16 = vector.load %arg5[%c0_7, %c0_8] : memref<128x256xbf16, #tpu.memory_space<vmem>>, vector<128x256xbf16>
    %cst_9 = arith.constant dense<0.000000e+00> : vector<80x256xf32>
    %17 = tpu.matmul %15, %16, %cst_9 {dimension_numbers = #tpu.dot_dimension_numbers<[1], [0], [0], [1], [0, 0, 1, 1], [], []>} : vector<80x128xbf16>, vector<128x256xbf16>, vector<80x256xf32> -> vector<80x256xf32>
    %18 = arith.truncf %1 : vector<80x128xf32> to vector<80x128xbf16>
    %c0_10 = arith.constant 0 : index
    %c0_11 = arith.constant 0 : index
    %19 = vector.load %arg6[%c0_10, %c0_11] : memref<128x256xbf16, #tpu.memory_space<vmem>>, vector<128x256xbf16>
    %cst_12 = arith.constant dense<0.000000e+00> : vector<80x256xf32>
    %20 = tpu.matmul %18, %19, %cst_12 {dimension_numbers = #tpu.dot_dimension_numbers<[1], [0], [0], [1], [0, 0, 1, 1], [], []>} : vector<80x128xbf16>, vector<128x256xbf16>, vector<80x256xf32> -> vector<80x256xf32>
    %21 = arith.addf %17, %20 : vector<80x256xf32>
    %c0_13 = arith.constant 0 : index
    %c0_14 = arith.constant 0 : index
    %22 = vector.load %arg7[%c0_13, %c0_14] : memref<1x256xf32, #tpu.memory_space<vmem>>, vector<1x256xf32>
    %23 = vector.broadcast %22 : vector<1x256xf32> to vector<80x256xf32>
    %24 = arith.addf %21, %23 : vector<80x256xf32>
    %25 = vector.extract_strided_slice %24 {offsets = [0, 0], sizes = [80, 128], strides = [1, 1]} : vector<80x256xf32> to vector<80x128xf32>
    %26 = arith.negf %25 : vector<80x128xf32>
    %27 = math.exp %26 : vector<80x128xf32>
    %cst_15 = arith.constant 1.000000e+00 : f32
    %28 = vector.broadcast %cst_15 : f32 to vector<80x128xf32>
    %29 = arith.addf %28, %27 : vector<80x128xf32>
    %30 = arith.divf %28, %29 : vector<80x128xf32>
    %cst_16 = arith.constant 2.000000e+00 : f32
    %31 = vector.broadcast %cst_16 : f32 to vector<80x128xf32>
    %32 = arith.mulf %31, %30 : vector<80x128xf32>
    %cst_17 = arith.constant 1.000000e+00 : f32
    %33 = vector.broadcast %cst_17 : f32 to vector<80x128xf32>
    %34 = arith.subf %33, %32 : vector<80x128xf32>
    %35 = vector.extract_strided_slice %24 {offsets = [0, 128], sizes = [80, 128], strides = [1, 1]} : vector<80x256xf32> to vector<80x128xf32>
    %36 = arith.negf %35 : vector<80x128xf32>
    %37 = math.exp %36 : vector<80x128xf32>
    %cst_18 = arith.constant 1.000000e+00 : f32
    %38 = vector.broadcast %cst_18 : f32 to vector<80x128xf32>
    %39 = arith.addf %38, %37 : vector<80x128xf32>
    %40 = arith.divf %38, %39 : vector<80x128xf32>
    %cst_19 = arith.constant 2.000000e+00 : f32
    %41 = vector.broadcast %cst_19 : f32 to vector<80x128xf32>
    %42 = arith.mulf %41, %40 : vector<80x128xf32>
    %c0_20 = arith.constant 0 : index
    %c0_21 = arith.constant 0 : index
    %43 = memref.load %arg1[%c0_20, %c0_21] : memref<1x1xf32, #tpu.memory_space<smem>>
    %44 = arith.mulf %1, %42 : vector<80x128xf32>
    %45 = vector.broadcast %43 : f32 to vector<80x128xf32>
    %46 = arith.mulf %45, %34 : vector<80x128xf32>
    %47 = arith.mulf %46, %14 : vector<80x128xf32>
    %48 = arith.addf %44, %47 : vector<80x128xf32>
    %c0_22 = arith.constant 0 : index
    %c0_23 = arith.constant 0 : index
    %49 = vector.load %arg8[%c0_22, %c0_23] : memref<80x128xf32, #tpu.memory_space<vmem>>, vector<80x128xf32>
    tpu.vector_store %arg8[%c0_22, %c0_23], %48 {strides = array<i32>} : memref<80x128xf32, #tpu.memory_space<vmem>>, vector<80x128xf32>,
    return
  }
  func.func @transform_0(%arg0: i32) -> (i32, i32) {
    %c0_i32 = arith.constant 0 : i32
    %c0_i32_0 = arith.constant 0 : i32
    %c0_i32_1 = arith.constant 0 : i32
    return %c0_i32, %c0_i32_0 : i32, i32
  }
  func.func @transform_1(%arg0: i32) -> (i32, i32) {
    %c0_i32 = arith.constant 0 : i32
    %c0_i32_0 = arith.constant 0 : i32
    return %arg0, %c0_i32 : i32, i32
  }
  func.func @transform_2(%arg0: i32) -> (i32, i32) {
    %c0_i32 = arith.constant 0 : i32
    %c0_i32_0 = arith.constant 0 : i32
    return %arg0, %c0_i32 : i32, i32
  }
  func.func @transform_3(%arg0: i32) -> (i32, i32) {
    %c0_i32 = arith.constant 0 : i32
    %c0_i32_0 = arith.constant 0 : i32
    %c0_i32_1 = arith.constant 0 : i32
    return %c0_i32, %c0_i32_0 : i32, i32
  }
  func.func @transform_4(%arg0: i32) -> (i32, i32) {
    %c0_i32 = arith.constant 0 : i32
    %c0_i32_0 = arith.constant 0 : i32
    %c0_i32_1 = arith.constant 0 : i32
    return %c0_i32, %c0_i32_0 : i32, i32
  }
  func.func @transform_5(%arg0: i32) -> (i32, i32) {
    %c0_i32 = arith.constant 0 : i32
    %c0_i32_0 = arith.constant 0 : i32
    %c0_i32_1 = arith.constant 0 : i32
    return %c0_i32, %c0_i32_0 : i32, i32
  }
  func.func @transform_6(%arg0: i32) -> (i32, i32) {
    %c0_i32 = arith.constant 0 : i32
    %c0_i32_0 = arith.constant 0 : i32
    %c0_i32_1 = arith.constant 0 : i32
    return %c0_i32, %c0_i32_0 : i32, i32
  }
  func.func @transform_7(%arg0: i32) -> (i32, i32) {
    %c0_i32 = arith.constant 0 : i32
    %c0_i32_0 = arith.constant 0 : i32
    return %arg0, %c0_i32 : i32, i32
  }
}

</mosaic_0001>

<bundles_post_ra>
// kernel: tpu_custom_call.1
= control target key start
LH: loop header
LB: loop body
LE: loop exit
PB: predicated region body
PF: predicated region fallthrough
CT: control target
= control target key end

     0   :  { %13 = vsyncpa [#allocation4], 0  ;;  %s1393_s0 = inlined_call_operand.<no memory space> [shape: f32[1,1], index: 0, kind: input, shape index: {}]   ;;  %s1394_s1 = inlined_call_operand.hbm [shape: f32[80,128], index: 1, kind: input, shape index: {}]   ;;  %s1395_s2 = inlined_call_operand.hbm [shape: f32[80,128], index: 2, kind: input, shape index: {}]   ;;  %s1396_s3 = inlined_call_operand.vmem [shape: f32[1,128], index: 3, kind: input, shape index: {}]   ;;  %s1397_s4 = inlined_call_operand.hbm [shape: bf16[128,256], index: 4, kind: input, shape index: {}]   ;;  %s1398_s5 = inlined_call_operand.hbm [shape: bf16[128,256], index: 5, kind: input, shape index: {}]   ;;  %s1399_s6 = inlined_call_operand.vmem [shape: f32[1,256], index: 6, kind: input, shape index: {}]   ;;  %s1400_s7 = inlined_call_operand.hbm [shape: f32[80,128], index: 7, kind: output, shape index: {}]  }
   0x1   :  { %14 = vsyncpa [#allocation7], 0 }
   0x2   :  { %15 = vsyncpa [#allocation10], 0 }
   0x3   :  { %16 = vsyncpa [#allocation5], 0  ;;  %s1130_s24 = smov [#allocation6]   ;;  %s1131_s26 = smov [#allocation3]  }
   0x4   :  { %s36_s25 = sshll.u32 %s1130_s24, 4  ;;  %s24_s27 = sshll.u32 %s1131_s26, 4  ;;  %s37_s25 = int_to_ptr.vmem [resolvable:$true] %s36_s25  ;;  %s25_s27 = int_to_ptr.vmem [resolvable:$true] %s24_s27 }
   0x5   :  { %s1030_s28 = scalar_lea.vmem %s37_s25, 1280  ;;  %p1035_p1 = scmp.lt.s32.totalorder %s37_s25, %s37_s25 }
   0x6   :  { %p1031_p0 = scmp.ne.s32.totalorder %s37_s25, %s1030_s28  ;;  %p1036_p2 = scmp.lt.s32.totalorder %s1030_s28, %s1030_s28 }
   0x8   :  { %p1037_p3 = por %p1036_p2, %p1035_p1 }
   0xa   :  { %p1038_p4 = pnand %p1037_p3, %p1031_p0 }
   0xc   :  { %1041 = shalt.err (!%p1038_p4)
}
   0xd   :  { %s1132_s29 = smov 128   ;;  %s1133_s30 = smov 8  }
   0xe   :  { %42 = dma.hbm_to_vmem [thread:$0]  %s1395_s2, 1280, %s37_s25, [#allocation7], %s1132_s29, %s1132_s29, %s1133_s30  }
   0xf   :  { %s1050_s10 = scalar_lea.vmem %s25_s27, 1280  ;;  %p1055_p6 = scmp.lt.s32.totalorder %s25_s27, %s25_s27 }
  0x10   :  { %p1051_p5 = scmp.ne.s32.totalorder %s25_s27, %s1050_s10  ;;  %p1056_p7 = scmp.lt.s32.totalorder %s1050_s10, %s1050_s10 }
  0x12   :  { %p1057_p8 = por %p1056_p7, %p1055_p6 }
  0x14   :  { %p1058_p9 = pnand %p1057_p8, %p1051_p5 }
  0x16   :  { %1061 = shalt.err (!%p1058_p9)
}
  0x17   :  { %30 = dma.hbm_to_vmem [thread:$0]  %s1394_s1, 1280, %s25_s27, [#allocation4], %s1132_s29, %s1132_s29, %s1133_s30  }
  0x18   :  { %s1134_s13 = smov [#allocation8]   ;;  %s1135_s15 = smov [#allocation9]  }
  0x19   :  { %s50_s14 = sshll.u32 %s1134_s13, 4  ;;  %s62_s16 = sshll.u32 %s1135_s15, 4  ;;  %s51_s14 = int_to_ptr.vmem [resolvable:$true] %s50_s14  ;;  %s63_s16 = int_to_ptr.vmem [resolvable:$true] %s62_s16 }
  0x1a   :  { %s1070_s2 = scalar_lea.vmem %s51_s14, 2048  ;;  %p1075_p11 = scmp.lt.s32.totalorder %s51_s14, %s51_s14 }
  0x1b   :  { %p1071_p10 = scmp.ne.s32.totalorder %s51_s14, %s1070_s2  ;;  %p1076_p12 = scmp.lt.s32.totalorder %s1070_s2, %s1070_s2 }
  0x1d   :  { %p1077_p13 = por %p1076_p12, %p1075_p11 }
  0x1f   :  { %p1078_p0 = pnand %p1077_p13, %p1071_p10 }
  0x21   :  { %1081 = shalt.err (!%p1078_p0)
}
  0x22   :  { %56 = dma.hbm_to_vmem [thread:$0]  %s1397_s4, 2048, %s51_s14, [#allocation7], %s1132_s29, %s1132_s29, %s1133_s30  }
  0x23   :  { %s1090_s1 = scalar_lea.vmem %s63_s16, 2048  ;;  %p1095_p2 = scmp.lt.s32.totalorder %s63_s16, %s63_s16 }
  0x24   :  { %p1091_p1 = scmp.ne.s32.totalorder %s63_s16, %s1090_s1  ;;  %p1096_p3 = scmp.lt.s32.totalorder %s1090_s1, %s1090_s1 }
  0x26   :  { %p1097_p4 = por %p1096_p3, %p1095_p2 }
  0x28   :  { %p1098_p5 = pnand %p1097_p4, %p1091_p1 }
  0x2a   :  { %1101 = shalt.err (!%p1098_p5)
}
  0x2b   :  { %68 = dma.hbm_to_vmem [thread:$0]  %s1398_s5, 2048, %s63_s16, [#allocation10], %s1132_s29, %s1132_s29, %s1133_s30  }
  0x2c   :  { %1122 = dma.done.wait [#allocation4], 1280  }
  0x2d   :  { %1123 = vsyncadd [#allocation4], 4294966016 }
  0x2e   :  { %1124 = dma.done.wait [#allocation7], 3328  }
  0x2f   :  { %1125 = vsyncadd [#allocation7], 4294963968 }
  0x30   :  { %1126 = dma.done.wait [#allocation10], 2048  }
  0x31   :  { %1127 = vsyncadd [#allocation10], 4294965248  ;;  %v1202_v0 = vld [vmem:[#allocation3] sm:$0xff]  ;;  %v1204_v1 = vld [vmem:[#allocation3 + $0x10] sm:$0xff]  ;;  %v1136_v46 = vmov 0  }
  0x32   :  { %v1206_v2 = vld [vmem:[#allocation3 + $0x8] sm:$0xff]  ;;  %v104_v3 = vmul.f32 %v1202_v0, %v1202_v0  ;;  %v106_v4 = vmul.f32 %v1204_v1, %v1204_v1  ;;  %v1212_v5 = vld [vmem:[#allocation3 + $0x18] sm:$0xff]  ;;  %v1220_v9 = vld [vmem:[#allocation3 + $0x20] sm:$0xff]  ;;  %346 = vmatprep.mubr.bf16.mxu0 %v1136_v46  ;;  %509 = vmatprep.mubr.bf16.mxu1 %v1136_v46 }
  0x33   :  { %v1214_v6 = vld [vmem:[#allocation3 + $0x28] sm:$0xff]  ;;  %v105_v7 = vmul.f32 %v1206_v2, %v1206_v2  ;;  %v107_v8 = vmul.f32 %v1212_v5, %v1212_v5  ;;  %v874_v10 = vld [vmem:[#allocation9 + $0x74] ss:$8 sps:$4 sm:$0xff]   ;;  %v876_v11 = vld [vmem:[#allocation9 + $0x70] ss:$8 sps:$4 sm:$0xff]   ;;  %v108_v17 = vmul.f32 %v1220_v9, %v1220_v9 }
  0x34   :  { %114 = vadd.xlane.f32.xlu0 %v104_v3  ;;  %118 = vadd.xlane.f32.xlu1 %v106_v4  ;;  %v877_v12 = vld [vmem:[#allocation9 + $0x64] ss:$8 sps:$4 sm:$0xff]   ;;  %v1222_v13 = vld [vmem:[#allocation3 + $0x38] sm:$0xff]  ;;  %v1224_v14 = vld [vmem:[#allocation3 + $0x30] sm:$0xff]  ;;  %v109_v16 = vmul.f32 %v1214_v6, %v1214_v6 }
  0x35   :  { %314 = vmatprep.subr.bf16.mxu0 %v874_v10  ;;  %v880_v15 = vld [vmem:[#allocation8 + $0x74] ss:$8 sps:$4 sm:$0xff]   ;;  %v882_v18 = vld [vmem:[#allocation8 + $0x70] ss:$8 sps:$4 sm:$0xff]   ;;  %v879_v19 = vld [vmem:[#allocation9 + $0x60] ss:$8 sps:$4 sm:$0xff]   ;;  %v111_v24 = vmul.f32 %v1222_v13, %v1222_v13  ;;  %v110_v25 = vmul.f32 %v1224_v14, %v1224_v14 }
  0x36   :  { %315 = vmatpush1.bf16.msra.mxu0 %v876_v11  ;;  %477 = vmatprep.subr.bf16.mxu1 %v880_v15  ;;  %v883_v20 = vld [vmem:[#allocation9 + $0x54] ss:$8 sps:$4 sm:$0xff]   ;;  %v1230_v21 = vld [vmem:[#allocation3 + $0x48] sm:$0xff]  ;;  %v1232_v22 = vld [vmem:[#allocation3 + $0x40] sm:$0xff] }
  0x37   :  { %316 = vmatprep.subr.bf16.mxu0 %v877_v12  ;;  %478 = vmatpush1.bf16.msra.mxu1 %v882_v18  ;;  %v885_v23 = vld [vmem:[#allocation9 + $0x50] ss:$8 sps:$4 sm:$0xff]   ;;  %v886_v26 = vld [vmem:[#allocation8 + $0x64] ss:$8 sps:$4 sm:$0xff]   ;;  %v888_v27 = vld [vmem:[#allocation8 + $0x60] ss:$8 sps:$4 sm:$0xff]   ;;  %v113_v30 = vmul.f32 %v1230_v21, %v1230_v21  ;;  %v112_v31 = vmul.f32 %v1232_v22, %v1232_v22 }
  0x38   :  { %116 = vadd.xlane.f32.xlu0 %v105_v7  ;;  %120 = vadd.xlane.f32.xlu1 %v107_v8  ;;  %v889_v28 = vld [vmem:[#allocation9 + $0x44] ss:$8 sps:$4 sm:$0xff]   ;;  %v891_v29 = vld [vmem:[#allocation9 + $0x40] ss:$8 sps:$4 sm:$0xff]   ;;  %v892_v32 = vld [vmem:[#allocation8 + $0x54] ss:$8 sps:$4 sm:$0xff]  }
  0x39   :  { %479 = vmatprep.subr.bf16.mxu1 %v886_v26  ;;  %v894_v33 = vld [vmem:[#allocation8 + $0x50] ss:$8 sps:$4 sm:$0xff]   ;;  %v895_v34 = vld [vmem:[#allocation9 + $0x34] ss:$8 sps:$4 sm:$0xff]   ;;  %v898_v35 = vld [vmem:[#allocation8 + $0x44] ss:$8 sps:$4 sm:$0xff]  }
  0x3a   :  { %317 = vmatpush1.bf16.msra.mxu0 %v879_v19  ;;  %v897_v36 = vld [vmem:[#allocation9 + $0x30] ss:$8 sps:$4 sm:$0xff]   ;;  %v900_v37 = vld [vmem:[#allocation8 + $0x40] ss:$8 sps:$4 sm:$0xff]   ;;  %v901_v38 = vld [vmem:[#allocation9 + $0x24] ss:$8 sps:$4 sm:$0xff]  }
  0x3b   :  { %318 = vmatprep.subr.bf16.mxu0 %v883_v20  ;;  %480 = vmatpush1.bf16.msra.mxu1 %v888_v27  ;;  %v904_v39 = vld [vmem:[#allocation8 + $0x34] ss:$8 sps:$4 sm:$0xff]   ;;  %v906_v40 = vld [vmem:[#allocation8 + $0x30] ss:$8 sps:$4 sm:$0xff]   ;;  %v910_v41 = vld [vmem:[#allocation8 + $0x24] ss:$8 sps:$4 sm:$0xff]  }
  0x3c   :  { %124 = vadd.xlane.f32.xlu1 %v109_v16  ;;  %122 = vadd.xlane.f32.xlu0 %v108_v17  ;;  %v903_v42 = vld [vmem:[#allocation9 + $0x20] ss:$8 sps:$4 sm:$0xff]   ;;  %v907_v43 = vld [vmem:[#allocation9 + $0x14] ss:$8 sps:$4 sm:$0xff]   ;;  %v909_v47 = vld [vmem:[#allocation9 + $0x10] ss:$8 sps:$4 sm:$0xff]  }
  0x3d   :  { %481 = vmatprep.subr.bf16.mxu1 %v892_v32  ;;  %v912_v44 = vld [vmem:[#allocation8 + $0x20] ss:$8 sps:$4 sm:$0xff]   ;;  %v916_v45 = vld [vmem:[#allocation8 + $0x14] ss:$8 sps:$4 sm:$0xff]   ;;  %v913_v48 = vld [vmem:[#allocation9 + $0x4] ss:$8 sps:$4 sm:$0xff]  }
  0x3e   :  { %319 = vmatpush1.bf16.msra.mxu0 %v885_v23  ;;  %v918_v49 = vld [vmem:[#allocation8 + $0x10] ss:$8 sps:$4 sm:$0xff]   ;;  %v919_v50 = vld [vmem:[#allocation8 + $0x4] ss:$8 sps:$4 sm:$0xff]   ;;  %v915_v51 = vld [vmem:[#allocation9] ss:$8 sps:$4 sm:$0xff]  }
  0x3f   :  { %320 = vmatprep.subr.bf16.mxu0 %v889_v28  ;;  %482 = vmatpush1.bf16.msra.mxu1 %v894_v33  ;;  %v1244_v52 = vld [vmem:[#allocation6] sm:$0xff]  ;;  %v1246_v53 = vld [vmem:[#allocation6 + $0x8] sm:$0xff]  ;;  %v921_v54 = vld [vmem:[#allocation8] ss:$8 sps:$4 sm:$0xff]  }
  0x40   :  { %128 = vadd.xlane.f32.xlu1 %v111_v24  ;;  %126 = vadd.xlane.f32.xlu0 %v110_v25  ;;  %v213_v55 = vpack.c.bf16 %v1246_v53, %v1244_v52  ;;  %v1251_v56 = vld [vmem:[#allocation6 + $0x10] sm:$0xff]  ;;  %v1253_v57 = vld [vmem:[#allocation6 + $0x18] sm:$0xff]  ;;  %v1258_v59 = vld [vmem:[#allocation6 + $0x20] sm:$0xff] }
  0x41   :  { %483 = vmatprep.subr.bf16.mxu1 %v898_v35  ;;  %v214_v58 = vpack.c.bf16 %v1253_v57, %v1251_v56  ;;  %v1260_v60 = vld [vmem:[#allocation6 + $0x28] sm:$0xff]  ;;  %v1265_v62 = vld [vmem:[#allocation6 + $0x30] sm:$0xff]  ;;  %v1267_v63 = vld [vmem:[#allocation6 + $0x38] sm:$0xff] }
  0x42   :  { %321 = vmatpush1.bf16.msra.mxu0 %v891_v29  ;;  %v215_v61 = vpack.c.bf16 %v1260_v60, %v1258_v59  ;;  %v216_v3 = vpack.c.bf16 %v1267_v63, %v1265_v62  ;;  %v1272_v4 = vld [vmem:[#allocation6 + $0x40] sm:$0xff]  ;;  %v1274_v7 = vld [vmem:[#allocation6 + $0x48] sm:$0xff] }
  0x43   :  { %322 = vmatprep.subr.bf16.mxu0 %v895_v34  ;;  %484 = vmatpush1.bf16.msra.mxu1 %v900_v37  ;;  %v217_v8 = vpack.c.bf16 %v1274_v7, %v1272_v4 }
  0x44   :  { %132 = vadd.xlane.f32.xlu1 %v113_v30  ;;  %130 = vadd.xlane.f32.xlu0 %v112_v31 }
  0x45   :  { %485 = vmatprep.subr.bf16.mxu1 %v904_v39 }
  0x46   :  { %323 = vmatpush1.bf16.msra.mxu0 %v897_v36 }
  0x47   :  { %324 = vmatprep.subr.bf16.mxu0 %v901_v38  ;;  %486 = vmatpush1.bf16.msra.mxu1 %v906_v40 }
  0x48   :  { %487 = vmatprep.subr.bf16.mxu1 %v910_v41 }
  0x4a   :  { %325 = vmatpush1.bf16.msra.mxu0 %v903_v42  ;;  %v813_v42 = vld [vmem:[%s1396_s3] ss:$0 sm:$0xff] }
  0x4b   :  { %326 = vmatprep.subr.bf16.mxu0 %v907_v43  ;;  %488 = vmatpush1.bf16.msra.mxu1 %v912_v44 }
  0x4c   :  { %489 = vmatprep.subr.bf16.mxu1 %v916_v45 }
  0x4e   :  { %327 = vmatpush1.bf16.msra.mxu0 %v909_v47 }
  0x4f   :  { %328 = vmatprep.subr.bf16.mxu0 %v913_v48  ;;  %490 = vmatpush1.bf16.msra.mxu1 %v918_v49 }
  0x50   :  { %491 = vmatprep.subr.bf16.mxu1 %v919_v50 }
  0x52   :  { %329 = vmatpush1.bf16.msra.mxu0 %v915_v51 }
  0x53   :  { %492 = vmatpush1.bf16.msra.mxu1 %v921_v54 }
  0x55   :  { %347 = vmatmul.mubr.bf16.vlgmr.msra.gmra.mxu0 %v213_v55 }
  0x56   :  { %356 = vmatprep.mubr.bf16.mxu0 %v1136_v46 }
  0x5d   :  { %357 = vmatmul.mubr.bf16.gmra.mxu0 %v214_v58 }
  0x5e   :  { %366 = vmatprep.mubr.bf16.mxu0 %v1136_v46 }
  0x65   :  { %367 = vmatmul.mubr.bf16.gmra.mxu0 %v215_v61 }
  0x66   :  { %376 = vmatprep.mubr.bf16.mxu0 %v1136_v46 }
  0x6d   :  { %377 = vmatmul.mubr.bf16.gmra.mxu0 %v216_v3 }
  0x6e   :  { %386 = vmatprep.mubr.bf16.mxu0 %v1136_v46 }
  0x75   :  { %387 = vmatmul.mubr.bf16.gmra.mxu0 %v217_v8 }
  0xbd   :  { %v115_v10 = vpop.xlane.xlu0 %114  ;;  %v119_v11 = vpop.xlane.xlu1 %118 }
  0xbe   :  { %v135_v12 = vmul.f32 0.0078125, %v115_v10  ;;  %v137_v15 = vmul.f32 0.0078125, %v119_v11 }
  0xc0   :  { %v145_v16 = vadd.f32 1.1920929e-07, %v135_v12  ;;  %v147_v23 = vadd.f32 1.1920929e-07, %v137_v15 }
  0xc1   :  { %v117_v17 = vpop.xlane.xlu0 %116  ;;  %v121_v18 = vpop.xlane.xlu1 %120 }
  0xc2   :  { %922 = vrsqrt.f32 %v145_v16  ;;  %v136_v19 = vmul.f32 0.0078125, %v117_v17  ;;  %v138_v20 = vmul.f32 0.0078125, %v121_v18 }
  0xc4   :  { %v146_v24 = vadd.f32 1.1920929e-07, %v136_v19  ;;  %v148_v25 = vadd.f32 1.1920929e-07, %v138_v20 }
  0xc5   :  { %v125_v26 = vpop.xlane.xlu1 %124  ;;  %v123_v27 = vpop.xlane.xlu0 %122 }
  0xc6   :  { %924 = vrsqrt.f32 %v146_v24  ;;  %v140_v28 = vmul.f32 0.0078125, %v125_v26  ;;  %v139_v29 = vmul.f32 0.0078125, %v123_v27 }
  0xc7   :  { %926 = vrsqrt.f32 %v147_v23 }
  0xc8   :  { %928 = vrsqrt.f32 %v148_v25  ;;  %v150_v30 = vadd.f32 1.1920929e-07, %v140_v28  ;;  %v149_v31 = vadd.f32 1.1920929e-07, %v139_v29 }
  0xc9   :  { %v129_v32 = vpop.xlane.xlu1 %128  ;;  %v127_v33 = vpop.xlane.xlu0 %126 }
  0xca   :  { %930 = vrsqrt.f32 %v150_v30  ;;  %v142_v34 = vmul.f32 0.0078125, %v129_v32  ;;  %v141_v35 = vmul.f32 0.0078125, %v127_v33 }
  0xcb   :  { %932 = vrsqrt.f32 %v149_v31 }
  0xcc   :  { %v152_v37 = vadd.f32 1.1920929e-07, %v142_v34  ;;  %v151_v38 = vadd.f32 1.1920929e-07, %v141_v35 }
  0xcd   :  { %v133_v40 = vpop.xlane.xlu1 %132  ;;  %v131_v43 = vpop.xlane.xlu0 %130 }
  0xce   :  { %934 = vrsqrt.f32 %v152_v37  ;;  %v144_v48 = vmul.f32 0.0078125, %v133_v40  ;;  %v143_v51 = vmul.f32 0.0078125, %v131_v43 }
  0xcf   :  { %v923_v36 = vpop.eup %922  ;;  %936 = vrsqrt.f32 %v151_v38 }
  0xd0   :  { %v165_v39 = vmul.f32 %v923_v36, %v1202_v0  ;;  %v154_v58 = vadd.f32 1.1920929e-07, %v144_v48 }
  0xd2   :  { %v1283_v49 = vmul.f32 %v813_v42, %v165_v39  ;;  %938 = vrsqrt.f32 %v154_v58 }
  0xd3   :  { %v925_v41 = vpop.eup %924 }
  0xd4   :  { %v927_v44 = vpop.eup %926  ;;  %v166_v45 = vmul.f32 %v925_v41, %v1206_v2  ;;  %v153_v2 = vadd.f32 1.1920929e-07, %v143_v51 }
  0xd5   :  { %v929_v47 = vpop.eup %928  ;;  %v167_v54 = vmul.f32 %v927_v44, %v1204_v1 }
  0xd6   :  { %v1285_v50 = vmul.f32 %v813_v42, %v166_v45  ;;  %v168_v55 = vmul.f32 %v929_v47, %v1212_v5  ;;  %940 = vrsqrt.f32 %v153_v2 }
  0xd7   :  { %v931_v61 = vpop.eup %930  ;;  %v1292_v8 = vmul.f32 %v813_v42, %v167_v54 }
  0xd8   :  { %v192_v0 = vpack.c.bf16 %v1285_v50, %v1283_v49  ;;  %v933_v3 = vpop.eup %932  ;;  %v1294_v10 = vmul.f32 %v813_v42, %v168_v55  ;;  %v170_v12 = vmul.f32 %v931_v61, %v1214_v6 }
  0xd9   :  { %v169_v11 = vmul.f32 %v933_v3, %v1220_v9 }
  0xda   :  { %510 = vmatmul.mubr.bf16.vlgmr.msra.gmra.mxu1 %v192_v0  ;;  %v193_v1 = vpack.c.bf16 %v1294_v10, %v1292_v8  ;;  %v1302_v16 = vmul.f32 %v813_v42, %v170_v12 }
  0xdb   :  { %519 = vmatprep.mubr.bf16.mxu1 %v1136_v46  ;;  %v935_v5 = vpop.eup %934  ;;  %v1300_v15 = vmul.f32 %v813_v42, %v169_v11 }
  0xdc   :  { %v937_v17 = vpop.eup %936  ;;  %v172_v9 = vmul.f32 %v935_v5, %v1222_v13 }
  0xdd   :  { %v194_v18 = vpack.c.bf16 %v1302_v16, %v1300_v15  ;;  %v171_v19 = vmul.f32 %v937_v17, %v1224_v14 }
  0xde   :  { %v1311_v23 = vmul.f32 %v813_v42, %v172_v9 }
  0xdf   :  { %v939_v6 = vpop.eup %938  ;;  %v1309_v20 = vmul.f32 %v813_v42, %v171_v19 }
  0xe0   :  { %v174_v27 = vmul.f32 %v939_v6, %v1230_v21 }
  0xe1   :  { %v195_v25 = vpack.c.bf16 %v1311_v23, %v1309_v20 }
  0xe2   :  { %520 = vmatmul.mubr.bf16.gmra.mxu1 %v193_v1  ;;  %v1320_v13 = vmul.f32 %v813_v42, %v174_v27 }
  0xe3   :  { %529 = vmatprep.mubr.bf16.mxu1 %v1136_v46  ;;  %v941_v24 = vpop.eup %940 }
  0xe4   :  { %v173_v26 = vmul.f32 %v941_v24, %v1232_v22  ;;  %v562_v22 = vlaneseq }
  0xe6   :  { %v1318_v14 = vmul.f32 %v813_v42, %v173_v26  ;;  %v563_v21 = vshrl.u32 %v562_v22, 7 }
  0xe8   :  { %v196_v28 = vpack.c.bf16 %v1320_v13, %v1318_v14  ;;  %v564_v37 = vsub.s32 0, %v563_v21  ;;  %v568_v39 = vsub.s32 1, %v563_v21 }
  0xea   :  { %530 = vmatmul.mubr.bf16.gmra.mxu1 %v194_v18 }
  0xeb   :  { %539 = vmatprep.mubr.bf16.mxu1 %v1136_v46 }
  0xf2   :  { %540 = vmatmul.mubr.bf16.gmra.mxu1 %v195_v25 }
  0xf3   :  { %549 = vmatprep.mubr.bf16.mxu1 %v1136_v46  ;;  %v560_v46 = vld [vmem:[%s1399_s6] sm:$0x3] }
  0xf4   :  { %v1328_v40 = vrot.slane %v560_v46, %v564_v37  ;;  %v1330_v44 = vrot.slane %v560_v46, %v568_v39 }
  0xfa   :  { %550 = vmatmul.mubr.bf16.gmra.mxu1 %v196_v28 }
 0x115   :  { %v348_v29 = vpop.f32.mrf.mxu0 }
 0x117   :  { %v350_v30 = vpop.f32.mrf.mxu0 }
 0x119   :  { %v352_v31 = vpop.f32.mrf.mxu0 }
 0x11b   :  { %v354_v32 = vpop.f32.mrf.mxu0 }
 0x11d   :  { %v358_v33 = vpop.f32.mrf.mxu0 }
 0x11f   :  { %v360_v34 = vpop.f32.mrf.mxu0 }
 0x121   :  { %v362_v35 = vpop.f32.mrf.mxu0 }
 0x123   :  { %v364_v36 = vpop.f32.mrf.mxu0 }
 0x125   :  { %v368_v38 = vpop.f32.mrf.mxu0 }
 0x127   :  { %v370_v41 = vpop.f32.mrf.mxu0 }
 0x129   :  { %v372_v51 = vpop.f32.mrf.mxu0 }
 0x12b   :  { %v374_v12 = vpop.f32.mrf.mxu0 }
 0x12d   :  { %v378_v25 = vpop.f32.mrf.mxu0 }
 0x19a   :  { %v511_v42 = vpop.f32.mrf.mxu1 }
 0x19b   :  { %v512_v43 = vadd.f32 %v511_v42, %v348_v29 }
 0x19c   :  { %v513_v45 = vpop.f32.mrf.mxu1 }
 0x19d   :  { %v572_v47 = vadd.f32 %v1328_v40, %v512_v43  ;;  %v514_v48 = vadd.f32 %v513_v45, %v350_v30 }
 0x19e   :  { %v515_v0 = vpop.f32.mrf.mxu1 }
 0x19f   :  { %v846_v54 = vmul.f32 -1.442695, %v572_v47  ;;  %v573_v55 = vadd.f32 %v1330_v44, %v514_v48  ;;  %v516_v58 = vadd.f32 %v515_v0, %v352_v31 }
 0x1a0   :  { %v517_v61 = vpop.f32.mrf.mxu1 }
 0x1a1   :  { %942 = vpow2.f32 %v846_v54  ;;  %v856_v2 = vmul.f32 -1.442695, %v573_v55  ;;  %v574_v3 = vadd.f32 %v1328_v40, %v516_v58  ;;  %v518_v11 = vadd.f32 %v517_v61, %v354_v32 }
 0x1a2   :  { %v521_v1 = vpop.f32.mrf.mxu1 }
 0x1a3   :  { %944 = vpow2.f32 %v856_v2  ;;  %v847_v5 = vmul.f32 -1.442695, %v574_v3  ;;  %v575_v17 = vadd.f32 %v1330_v44, %v518_v11  ;;  %v522_v18 = vadd.f32 %v521_v1, %v358_v33  ;;  %v380_v33 = vpop.f32.mrf.mxu0 }
 0x1a4   :  { %v523_v19 = vpop.f32.mrf.mxu1 }
 0x1a5   :  { %946 = vpow2.f32 %v847_v5  ;;  %v857_v9 = vmul.f32 -1.442695, %v575_v17  ;;  %v576_v6 = vadd.f32 %v1328_v40, %v522_v18  ;;  %v524_v24 = vadd.f32 %v523_v19, %v360_v34 }
 0x1a6   :  { %v525_v26 = vpop.f32.mrf.mxu1 }
 0x1a7   :  { %948 = vpow2.f32 %v857_v9  ;;  %v848_v27 = vmul.f32 -1.442695, %v576_v6  ;;  %v577_v28 = vadd.f32 %v1330_v44, %v524_v24  ;;  %v526_v29 = vadd.f32 %v525_v26, %v362_v35  ;;  %v382_v35 = vpop.f32.mrf.mxu0 }
 0x1a8   :  { %v527_v30 = vpop.f32.mrf.mxu1 }
 0x1a9   :  { %950 = vpow2.f32 %v848_v27  ;;  %v858_v31 = vmul.f32 -1.442695, %v577_v28  ;;  %v578_v32 = vadd.f32 %v1328_v40, %v526_v29  ;;  %v528_v22 = vadd.f32 %v527_v30, %v364_v36  ;;  %v384_v11 = vpop.f32.mrf.mxu0 }
 0x1aa   :  { %v531_v21 = vpop.f32.mrf.mxu1 }
 0x1ab   :  { %952 = vpow2.f32 %v858_v31  ;;  %v849_v37 = vmul.f32 -1.442695, %v578_v32  ;;  %v579_v46 = vadd.f32 %v1330_v44, %v528_v22  ;;  %v532_v34 = vadd.f32 %v531_v21, %v368_v38  ;;  %v388_v27 = vpop.f32.mrf.mxu0 }
 0x1ac   :  { %v533_v39 = vpop.f32.mrf.mxu1 }
 0x1ad   :  { %954 = vpow2.f32 %v849_v37  ;;  %v859_v42 = vmul.f32 -1.442695, %v579_v46  ;;  %v580_v43 = vadd.f32 %v1328_v40, %v532_v34  ;;  %v534_v45 = vadd.f32 %v533_v39, %v370_v41  ;;  %v390_v34 = vpop.f32.mrf.mxu0 }
 0x1ae   :  { %v943_v47 = vpop.eup %942  ;;  %v535_v48 = vpop.f32.mrf.mxu1 }
 0x1af   :  { %v622_v0 = vadd.f32 1.0, %v943_v47  ;;  %956 = vpow2.f32 %v859_v42  ;;  %v850_v54 = vmul.f32 -1.442695, %v580_v43  ;;  %v581_v36 = vadd.f32 %v1330_v44, %v534_v45 }
 0x1b0   :  { %v945_v55 = vpop.eup %944  ;;  %v536_v58 = vadd.f32 %v535_v48, %v372_v51  ;;  %v537_v61 = vpop.f32.mrf.mxu1 }
 0x1b1   :  { %958 = vrcp.f32 %v622_v0  ;;  %v702_v2 = vadd.f32 1.0, %v945_v55  ;;  %v860_v38 = vmul.f32 -1.442695, %v581_v36  ;;  %v538_v3 = vadd.f32 %v537_v61, %v374_v12 }
 0x1b2   :  { %v947_v1 = vpop.eup %946  ;;  %960 = vpow2.f32 %v850_v54  ;;  %v582_v41 = vadd.f32 %v1328_v40, %v536_v58  ;;  %v541_v5 = vpop.f32.mrf.mxu1 }
 0x1b3   :  { %962 = vrcp.f32 %v702_v2  ;;  %v623_v17 = vadd.f32 1.0, %v947_v1  ;;  %v583_v18 = vadd.f32 %v1330_v44, %v538_v3  ;;  %v542_v19 = vadd.f32 %v541_v5, %v378_v25  ;;  %v392_v58 = vpop.f32.mrf.mxu0 }
 0x1b4   :  { %v949_v9 = vpop.eup %948  ;;  %964 = vpow2.f32 %v860_v38  ;;  %v851_v6 = vmul.f32 -1.442695, %v582_v41  ;;  %v543_v51 = vpop.f32.mrf.mxu1 }
 0x1b5   :  { %966 = vrcp.f32 %v623_v17  ;;  %v703_v24 = vadd.f32 1.0, %v949_v9  ;;  %v861_v26 = vmul.f32 -1.442695, %v583_v18  ;;  %v584_v12 = vadd.f32 %v1328_v40, %v542_v19 }
 0x1b6   :  { %v951_v28 = vpop.eup %950  ;;  %968 = vpow2.f32 %v851_v6  ;;  %v544_v29 = vadd.f32 %v543_v51, %v380_v33  ;;  %v545_v30 = vpop.f32.mrf.mxu1  ;;  %v1353_v19 = vstv %s1393_s0  ;;  %s1137_s0 = smov [#allocation11]  }
 0x1b7   :  { %970 = vrcp.f32 %v703_v24  ;;  %v624_v31 = vadd.f32 1.0, %v951_v28  ;;  %v852_v32 = vmul.f32 -1.442695, %v584_v12  ;;  %v546_v22 = vadd.f32 %v545_v30, %v382_v35  ;;  %s799_s23 = sshll.u32 %s1137_s0, 4  ;;  %s800_s23 = int_to_ptr.vmem [resolvable:$true] %s799_s23 }
 0x1b8   :  { %v953_v21 = vpop.eup %952  ;;  %972 = vpow2.f32 %v861_v26  ;;  %v585_v25 = vadd.f32 %v1330_v44, %v544_v29  ;;  %v547_v37 = vpop.f32.mrf.mxu1  ;;  %s1102_s24 = scalar_lea.vmem %s800_s23, 1280  ;;  %p1107_p7 = scmp.lt.s32.totalorder %s800_s23, %s800_s23 }
 0x1b9   :  { %974 = vrcp.f32 %v624_v31  ;;  %v704_v46 = vadd.f32 1.0, %v953_v21  ;;  %v586_v39 = vadd.f32 %v1328_v40, %v546_v22  ;;  %v548_v42 = vadd.f32 %v547_v37, %v384_v11  ;;  %p1103_p6 = scmp.ne.s32.totalorder %s800_s23, %s1102_s24  ;;  %p1108_p8 = scmp.lt.s32.totalorder %s1102_s24, %s1102_s24 }
 0x1ba   :  { %v955_v43 = vpop.eup %954  ;;  %976 = vpow2.f32 %v852_v32  ;;  %v862_v45 = vmul.f32 -1.442695, %v585_v25  ;;  %v551_v33 = vpop.f32.mrf.mxu1 }
 0x1bb   :  { %978 = vrcp.f32 %v704_v46  ;;  %v625_v47 = vadd.f32 1.0, %v955_v43  ;;  %v853_v48 = vmul.f32 -1.442695, %v586_v39  ;;  %v587_v35 = vadd.f32 %v1330_v44, %v548_v42  ;;  %p1109_p9 = por %p1108_p8, %p1107_p7 }
 0x1bc   :  { %v957_v0 = vpop.eup %956  ;;  %980 = vpow2.f32 %v862_v45  ;;  %v552_v54 = vadd.f32 %v551_v33, %v388_v27  ;;  %v553_v36 = vpop.f32.mrf.mxu1 }
 0x1bd   :  { %982 = vrcp.f32 %v625_v47  ;;  %v705_v55 = vadd.f32 1.0, %v957_v0  ;;  %v863_v61 = vmul.f32 -1.442695, %v587_v35  ;;  %v554_v2 = vadd.f32 %v553_v36, %v390_v34  ;;  %v394_v27 = vpop.f32.mrf.mxu0  ;;  %p1110_p10 = pnand %p1109_p9, %p1103_p6 }
 0x1be   :  { %v959_v38 = vpop.eup %958  ;;  %984 = vpow2.f32 %v853_v48  ;;  %v588_v3 = vadd.f32 %v1328_v40, %v552_v54  ;;  %v555_v11 = vpop.f32.mrf.mxu1 }
 0x1bf   :  { %v961_v1 = vpop.eup %960  ;;  %v652_v41 = vmul.f32 2.0, %v959_v38  ;;  %986 = vrcp.f32 %v705_v55  ;;  %v589_v5 = vadd.f32 %v1330_v44, %v554_v2  ;;  %v556_v17 = vadd.f32 %v555_v11, %v392_v58 }
 0x1c0   :  { %v963_v18 = vpop.eup %962  ;;  %v626_v9 = vadd.f32 1.0, %v961_v1  ;;  %988 = vpow2.f32 %v863_v61  ;;  %v854_v6 = vmul.f32 -1.442695, %v588_v3  ;;  %v557_v51 = vpop.f32.mrf.mxu1 }
 0x1c1   :  { %v965_v24 = vpop.eup %964  ;;  %v662_v26 = vsub.f32 1.0, %v652_v41  ;;  %v732_v12 = vmul.f32 2.0, %v963_v18  ;;  %v864_v28 = vmul.f32 -1.442695, %v589_v5  ;;  %v590_v29 = vadd.f32 %v1328_v40, %v556_v17 }
 0x1c2   :  { %v967_v30 = vpop.eup %966  ;;  %990 = vrcp.f32 %v626_v9  ;;  %v706_v31 = vadd.f32 1.0, %v965_v24  ;;  %v558_v32 = vadd.f32 %v557_v51, %v394_v27 }
 0x1c3   :  { %v969_v22 = vpop.eup %968  ;;  %v754_v21 = vmul.f32 %v1353_v19, %v662_v26  ;;  %v743_v25 = vmul.f32 %v732_v12, %v1244_v52  ;;  %v653_v37 = vmul.f32 2.0, %v967_v30  ;;  %992 = vpow2.f32 %v854_v6 }
 0x1c4   :  { %v971_v46 = vpop.eup %970  ;;  %994 = vrcp.f32 %v706_v31  ;;  %v627_v34 = vadd.f32 1.0, %v969_v22  ;;  %v855_v39 = vmul.f32 -1.442695, %v590_v29  ;;  %v591_v42 = vadd.f32 %v1330_v44, %v558_v32 }
 0x1c5   :  { %v973_v43 = vpop.eup %972  ;;  %v764_v40 = vmul.f32 %v754_v21, %v1283_v49  ;;  %v663_v45 = vsub.f32 1.0, %v653_v37  ;;  %v733_v33 = vmul.f32 2.0, %v971_v46  ;;  %996 = vpow2.f32 %v864_v28 }
 0x1c6   :  { %v975_v47 = vpop.eup %974  ;;  %998 = vrcp.f32 %v627_v34  ;;  %v707_v48 = vadd.f32 1.0, %v973_v43  ;;  %v865_v44 = vmul.f32 -1.442695, %v591_v42 }
 0x1c7   :  { %v977_v35 = vpop.eup %976  ;;  %v774_v0 = vadd.f32 %v764_v40, %v743_v25  ;;  %v755_v52 = vmul.f32 %v1353_v19, %v663_v45  ;;  %v654_v54 = vmul.f32 2.0, %v975_v47  ;;  %v744_v55 = vmul.f32 %v733_v33, %v1246_v53 }
 0x1c8   :  { %v979_v36 = vpop.eup %978  ;;  %1000 = vrcp.f32 %v707_v48  ;;  %v628_v58 = vadd.f32 1.0, %v977_v35 }
 0x1c9   :  { %v981_v61 = vpop.eup %980  ;;  %784 = vst [vmem:[#allocation11] sm:$0xff] %v774_v0  ;;  %v765_v49 = vmul.f32 %v755_v52, %v1285_v50  ;;  %v664_v2 = vsub.f32 1.0, %v654_v54  ;;  %v734_v38 = vmul.f32 2.0, %v979_v36  ;;  %1002 = vpow2.f32 %v855_v39 }
 0x1ca   :  { %v983_v3 = vpop.eup %982  ;;  %1004 = vrcp.f32 %v628_v58  ;;  %v708_v11 = vadd.f32 1.0, %v981_v61 }
 0x1cb   :  { %v985_v1 = vpop.eup %984  ;;  %v775_v41 = vadd.f32 %v765_v49, %v744_v55  ;;  %v756_v5 = vmul.f32 %v1353_v19, %v664_v2  ;;  %v655_v17 = vmul.f32 2.0, %v983_v3  ;;  %v745_v53 = vmul.f32 %v734_v38, %v1251_v56 }
 0x1cc   :  { %v987_v18 = vpop.eup %986  ;;  %1006 = vrcp.f32 %v708_v11  ;;  %v629_v9 = vadd.f32 1.0, %v985_v1 }
 0x1cd   :  { %v989_v6 = vpop.eup %988  ;;  %785 = vst [vmem:[#allocation11 + $0x8] sm:$0xff] %v775_v41  ;;  %v766_v50 = vmul.f32 %v756_v5, %v1292_v8  ;;  %v665_v51 = vsub.f32 1.0, %v655_v17  ;;  %v735_v24 = vmul.f32 2.0, %v987_v18  ;;  %1008 = vpow2.f32 %v865_v44 }
 0x1ce   :  { %1010 = vrcp.f32 %v629_v9  ;;  %v709_v26 = vadd.f32 1.0, %v989_v6 }
 0x1cf   :  { %v991_v12 = vpop.eup %990  ;;  %v776_v27 = vadd.f32 %v766_v50, %v745_v53  ;;  %v757_v28 = vmul.f32 %v1353_v19, %v665_v51  ;;  %v746_v32 = vmul.f32 %v735_v24, %v1253_v57 }
 0x1d0   :  { %v993_v29 = vpop.eup %992  ;;  %v656_v30 = vmul.f32 2.0, %v991_v12  ;;  %1012 = vrcp.f32 %v709_v26 }
 0x1d1   :  { %v995_v31 = vpop.eup %994  ;;  %786 = vst [vmem:[#allocation11 + $0x10] sm:$0xff] %v776_v27  ;;  %v767_v56 = vmul.f32 %v757_v28, %v1294_v10  ;;  %v630_v22 = vadd.f32 1.0, %v993_v29 }
 0x1d2   :  { %v997_v8 = vpop.eup %996  ;;  %v666_v21 = vsub.f32 1.0, %v656_v30  ;;  %v736_v25 = vmul.f32 2.0, %v995_v31 }
 0x1d3   :  { %v999_v37 = vpop.eup %998  ;;  %v777_v46 = vadd.f32 %v767_v56, %v746_v32  ;;  %1014 = vrcp.f32 %v630_v22  ;;  %v710_v34 = vadd.f32 1.0, %v997_v8 }
 0x1d4   :  { %v758_v39 = vmul.f32 %v1353_v19, %v666_v21  ;;  %v657_v42 = vmul.f32 2.0, %v999_v37  ;;  %v747_v10 = vmul.f32 %v736_v25, %v1258_v59 }
 0x1d5   :  { %v1001_v43 = vpop.eup %1000  ;;  %787 = vst [vmem:[#allocation11 + $0x18] sm:$0xff] %v777_v46  ;;  %1016 = vrcp.f32 %v710_v34 }
 0x1d6   :  { %v1003_v40 = vpop.eup %1002  ;;  %v768_v45 = vmul.f32 %v758_v39, %v1300_v15  ;;  %v667_v57 = vsub.f32 1.0, %v657_v42  ;;  %v737_v33 = vmul.f32 2.0, %v1001_v43 }
 0x1d7   :  { %v1005_v47 = vpop.eup %1004  ;;  %v631_v48 = vadd.f32 1.0, %v1003_v40 }
 0x1d8   :  { %v778_v35 = vadd.f32 %v768_v45, %v747_v10  ;;  %v759_v0 = vmul.f32 %v1353_v19, %v667_v57  ;;  %v658_v52 = vmul.f32 2.0, %v1005_v47  ;;  %v748_v58 = vmul.f32 %v737_v33, %v1260_v60 }
 0x1d9   :  { %v1007_v54 = vpop.eup %1006  ;;  %1018 = vrcp.f32 %v631_v48 }
 0x1da   :  { %v1009_v36 = vpop.eup %1008  ;;  %788 = vst [vmem:[#allocation11 + $0x20] sm:$0xff] %v778_v35  ;;  %v769_v55 = vmul.f32 %v759_v0, %v1302_v16  ;;  %v668_v44 = vsub.f32 1.0, %v658_v52  ;;  %v738_v15 = vmul.f32 2.0, %v1007_v54 }
 0x1db   :  { %v1011_v61 = vpop.eup %1010  ;;  %v711_v59 = vadd.f32 1.0, %v1009_v36 }
 0x1dc   :  { %v779_v49 = vadd.f32 %v769_v55, %v748_v58  ;;  %v760_v2 = vmul.f32 %v1353_v19, %v668_v44  ;;  %v659_v38 = vmul.f32 2.0, %v1011_v61  ;;  %v749_v1 = vmul.f32 %v738_v15, %v1265_v62 }
 0x1dd   :  { %v1013_v3 = vpop.eup %1012  ;;  %1020 = vrcp.f32 %v711_v59 }
 0x1de   :  { %789 = vst [vmem:[#allocation11 + $0x28] sm:$0xff] %v779_v49  ;;  %v770_v11 = vmul.f32 %v760_v2, %v1309_v20  ;;  %v669_v41 = vsub.f32 1.0, %v659_v38  ;;  %v739_v5 = vmul.f32 2.0, %v1013_v3 }
 0x1e0   :  { %v1015_v16 = vpop.eup %1014  ;;  %v780_v17 = vadd.f32 %v770_v11, %v749_v1  ;;  %v761_v60 = vmul.f32 %v1353_v19, %v669_v41  ;;  %v750_v6 = vmul.f32 %v739_v5, %v1267_v63 }
 0x1e1   :  { %v660_v18 = vmul.f32 2.0, %v1015_v16 }
 0x1e2   :  { %v1017_v53 = vpop.eup %1016  ;;  %790 = vst [vmem:[#allocation11 + $0x30] sm:$0xff] %v780_v17  ;;  %v771_v9 = vmul.f32 %v761_v60, %v1311_v23 }
 0x1e3   :  { %v670_v50 = vsub.f32 1.0, %v660_v18  ;;  %v740_v51 = vmul.f32 2.0, %v1017_v53 }
 0x1e4   :  { %v781_v24 = vadd.f32 %v771_v9, %v750_v6 }
 0x1e5   :  { %v762_v20 = vmul.f32 %v1353_v19, %v670_v50  ;;  %v751_v12 = vmul.f32 %v740_v51, %v1272_v4 }
 0x1e6   :  { %v1019_v26 = vpop.eup %1018  ;;  %791 = vst [vmem:[#allocation11 + $0x38] sm:$0xff] %v781_v24 }
 0x1e7   :  { %v772_v62 = vmul.f32 %v762_v20, %v1318_v14  ;;  %v661_v27 = vmul.f32 2.0, %v1019_v26 }
 0x1e9   :  { %v782_v28 = vadd.f32 %v772_v62, %v751_v12  ;;  %v671_v29 = vsub.f32 1.0, %v661_v27 }
 0x1ea   :  { %v1021_v30 = vpop.eup %1020 }
 0x1eb   :  { %792 = vst [vmem:[#allocation11 + $0x40] sm:$0xff] %v782_v28  ;;  %v763_v23 = vmul.f32 %v1353_v19, %v671_v29  ;;  %v741_v31 = vmul.f32 2.0, %v1021_v30 }
 0x1ed   :  { %v773_v63 = vmul.f32 %v763_v23, %v1320_v13  ;;  %v752_v56 = vmul.f32 %v741_v31, %v1274_v7 }
 0x1ef   :  { %v783_v32 = vadd.f32 %v773_v63, %v752_v56 }
 0x1f1   :  { %793 = vst [vmem:[#allocation11 + $0x48] sm:$0xff] %v783_v32 }
 0x1f2   :  { %1113 = shalt.err (!%p1110_p10)
}
 0x1f3   :  { %805 = dma.vmem_to_hbm [thread:$0]  %s800_s23, 1280, %s1400_s7, [#allocation5], %s1132_s29, %s1132_s29, %s1133_s30  }
 0x1f4   :  { %1128 = dma.done.wait [#allocation5], 1280  }
 0x1f5   :  { %1129 = vsyncadd [#allocation5], 4294966016 }
 0x1f6   :  { %809 = vsyncpa [#allocation4], 1 }
 0x1f7   :  { %810 = vsyncpa [#allocation7], 1 }
 0x1f8   :  { %811 = vsyncpa [#allocation10], 1 }
 0x1f9   :  { %812 = vsyncpa [#allocation5], 1 }

</bundles_post_ra>
